<compile_context>
chip_gen: v7x
topology: tpu7x:2x2x1
jax: 0.10.0
libtpu: 0.0.40
codegen_flags: <defaults>
</compile_context>

<pallas_src>
import functools

import jax
import jax.numpy as jnp
from jax import lax
from jax.experimental import pallas as pl
from jax.experimental.pallas import tpu as pltpu

LANE = 128


def _round_up(x, m):
    return (x + m - 1) // m * m


def _device_kind():
    try:
        return jax.devices()[0].device_kind.lower()
    except Exception:
        return ""


def _pick_tq(hw, kind):
    """Query-tile length: full (8-padded) HW if small, else a gen-aware cap."""
    hw8 = _round_up(hw, 8)
    if "v7" in kind:
        cap = 256       # 64 MiB VMEM/TC: keep the (TQ, HW) energy tile small
    elif "v5" in kind:
        cap = 512
    else:
        cap = 1024      # v6e & co: 128 MiB VMEM, amortize per-grid-step cost
    return hw8 if hw8 <= cap else cap


def _vmem_limit_bytes(kind):
    if "v7" in kind:
        return 48 * 1024 * 1024    # leave headroom below v7x's 64 MiB physical
    return 100 * 1024 * 1024       # v5e / v6e have 128 MiB physical VMEM


def _self_attention_kernel(c, hw, n_chunks, use_mask, bf16_exp,
                           x_ref, wq_ref, bq_ref, wk_ref, bk_ref,
                           wv_ref, bv_ref, gamma_ref, o_ref,
                           q_scr, k_scr, v_scr):
    tq = o_ref.shape[1]          # query tile length
    qi = pl.program_id(1)        # query-tile index (inner, "arbitrary" axis)

    # Chunked q/k/v projection, computed once per batch element (qi == 0) into
    # bf16 VMEM scratch; only a (TQ, Cout) f32 transient exists at any time.
    @pl.when(qi == 0)
    def _():
        def proj_chunk(i, carry):
            rs = pl.multiple_of(i * tq, tq)
            xc = x_ref[0, pl.ds(rs, tq), :].astype(jnp.bfloat16)     # (TQ, C)
            q_scr[pl.ds(rs, tq), :] = (
                lax.dot_general(xc, wq_ref[...], (((1,), (0,)), ((), ())),
                                preferred_element_type=jnp.float32)
                + bq_ref[...]).astype(jnp.bfloat16)
            k_scr[pl.ds(rs, tq), :] = (
                lax.dot_general(xc, wk_ref[...], (((1,), (0,)), ((), ())),
                                preferred_element_type=jnp.float32)
                + bk_ref[...]).astype(jnp.bfloat16)
            # Value weight is augmented in the wrapper with a zero column and
            # bias 1.0, so this chunk is [v | 1] directly (row-sum column).
            v_scr[pl.ds(rs, tq), :] = (
                lax.dot_general(xc, wv_ref[...], (((1,), (0,)), ((), ())),
                                preferred_element_type=jnp.float32)
                + bv_ref[...]).astype(jnp.bfloat16)
            return carry

        lax.fori_loop(0, n_chunks, proj_chunk, 0, unroll=n_chunks <= 4)

    qs = pl.multiple_of(qi * tq, tq)
    q_tile = q_scr[pl.ds(qs, tq), :]                                 # (TQ, C8p)

    # energy[i, j] = <q_i, k_j>: contract the last dims directly (no k.T copy).
    energy = lax.dot_general(q_tile, k_scr[...], (((1,), (1,)), ((), ())),
                             preferred_element_type=jnp.float32)     # (TQ, HWp)
    if use_mask:
        # Spatial padding: padded key columns must not contribute to softmax.
        kidx = lax.broadcasted_iota(jnp.int32, energy.shape, 1)
        energy = jnp.where(kidx < hw, energy, -jnp.inf)

    m = jnp.max(energy, axis=-1, keepdims=True)
    z = energy - m
    if bf16_exp:
        # v6e/v7x: bf16-capable EUP/VPU -> exp over (TQ, HW) at 2x throughput,
        # and p is already bf16 for the MXU (no extra cast pass).
        p = jnp.exp(z.astype(jnp.bfloat16))
    else:
        # v5e: no bf16 VPU/EUP -> keep the exp in f32, cast only for the MXU.
        p = jnp.exp(z).astype(jnp.bfloat16)

    # PV matmul against [V | 1]: column c of the result is the softmax row-sum
    # accumulated in f32 on the MXU.  Normalize AFTER the matmul on (TQ, C).
    out_aug = lax.dot_general(p, v_scr[...], (((1,), (0,)), ((), ())),
                              preferred_element_type=jnp.float32)    # (TQ, C+1)
    attn_out = out_aug[:, :c]
    inv_sum = pl.reciprocal(out_aug[:, c:], approx=True)             # (TQ, 1)

    x_tile = x_ref[0, pl.ds(qs, tq), :]                              # (TQ, C) f32
    gamma = gamma_ref[0, 0]
    o_ref[0] = (gamma * (attn_out * inv_sum) + x_tile).astype(o_ref.dtype)


@jax.jit
def self_attention(x, wq, bq, wk, bk, wv, bv, gamma):
    """x: (B, C, H, W) float32 (NCHW, as in PyTorch). Returns same shape/dtype."""
    B, C, H, W = x.shape
    HW = H * W
    C8 = wq.shape[0]

    kind = _device_kind()
    TQ = _pick_tq(HW, kind)
    HWp = _round_up(HW, TQ)
    n_q = HWp // TQ
    C8p = _round_up(C8, LANE)      # lane-padded q/k channels (VMEM-only)

    # NCHW -> (B, HW, C) token-major, channels unpadded (lane-dense enough and
    # 4x less HBM traffic than padding C to 128 for small C).
    # TODO(synk): fuse this transpose (and the inverse below) into the
    # producing/consuming ops to drop the extra HBM round trips.
    x_t = jnp.transpose(x.reshape(B, C, HW), (0, 2, 1))
    if HWp != HW:
        x_t = jnp.pad(x_t, ((0, 0), (0, HWp - HW), (0, 0)))

    # Pre-transposed projection weights.  Zero-padded q/k columns keep the
    # energy exact; the value weight gets one extra zero column with bias 1.0
    # so the kernel's value scratch is [V | 1] (row-sum via the PV matmul).
    wq_p = jnp.pad(wq.T, ((0, 0), (0, C8p - C8))).astype(jnp.bfloat16)  # (C, C8p)
    wk_p = jnp.pad(wk.T, ((0, 0), (0, C8p - C8))).astype(jnp.bfloat16)  # (C, C8p)
    wv_a = jnp.pad(wv.T, ((0, 0), (0, 1))).astype(jnp.bfloat16)         # (C, C+1)
    bq_p = jnp.pad(bq, (0, C8p - C8)).reshape(1, C8p).astype(jnp.float32)
    bk_p = jnp.pad(bk, (0, C8p - C8)).reshape(1, C8p).astype(jnp.float32)
    bv_a = jnp.concatenate([bv, jnp.ones((1,), bv.dtype)]).reshape(1, C + 1)
    bv_a = bv_a.astype(jnp.float32)
    gamma2 = gamma.reshape(1, 1).astype(jnp.float32)

    kernel = functools.partial(_self_attention_kernel,
                               C, HW, n_q, HWp != HW, "v5" not in kind)

    # TODO(synk): for very large HW on v7x, add a key-axis tile loop (online
    # softmax) and/or hoist the projection into its own pallas_call so both
    # TensorCores can also share the query axis.
    out_t = pl.pallas_call(
        kernel,
        out_shape=jax.ShapeDtypeStruct((B, HWp, C), x.dtype),
        grid_spec=pltpu.PrefetchScalarGridSpec(
            num_scalar_prefetch=0,
            grid=(B, n_q),
            in_specs=[
                # Full-image x block: resident across the q axis (one HBM read
                # per batch element); used by the chunked projection and as the
                # per-tile residual.
                pl.BlockSpec((1, HWp, C), lambda b, q: (b, 0, 0)),
                pl.BlockSpec((C, C8p), lambda b, q: (0, 0)),     # Wq^T (padded)
                pl.BlockSpec((1, C8p), lambda b, q: (0, 0)),     # bq
                pl.BlockSpec((C, C8p), lambda b, q: (0, 0)),     # Wk^T (padded)
                pl.BlockSpec((1, C8p), lambda b, q: (0, 0)),     # bk
                pl.BlockSpec((C, C + 1), lambda b, q: (0, 0)),   # [Wv^T | 0]
                pl.BlockSpec((1, C + 1), lambda b, q: (0, 0)),   # [bv | 1]
                pl.BlockSpec((1, 1), lambda b, q: (0, 0),
                             memory_space=pltpu.MemorySpace.SMEM),  # gamma
            ],
            out_specs=pl.BlockSpec((1, TQ, C), lambda b, q: (b, q, 0)),
            scratch_shapes=[
                pltpu.VMEM((HWp, C8p), jnp.bfloat16),      # Q (all tokens)
                pltpu.VMEM((HWp, C8p), jnp.bfloat16),      # K
                pltpu.VMEM((HWp, C + 1), jnp.bfloat16),    # [V | 1]
            ],
        ),
        compiler_params=pltpu.CompilerParams(
            dimension_semantics=("parallel", "arbitrary"),
            vmem_limit_bytes=_vmem_limit_bytes(kind),
        ),
    )(x_t, wq_p, bq_p, wk_p, bk_p, wv_a, bv_a, gamma2)

    # Strip spatial padding, back to NCHW.
    out_t = out_t[:, :HW, :]
    return jnp.transpose(out_t, (0, 2, 1)).reshape(B, C, H, W)


def _reference(x, wq, bq, wk, bk, wv, bv, gamma):
    """Pure-JAX (f32) re-implementation of the PyTorch forward (NCHW)."""
    B, C, H, W = x.shape
    HW = H * W
    xf = x.reshape(B, C, HW)
    q = jnp.einsum('oc,bcn->bon', wq, xf) + bq[None, :, None]      # (B, C/8, HW)
    k = jnp.einsum('oc,bcn->bon', wk, xf) + bk[None, :, None]      # (B, C/8, HW)
    v = jnp.einsum('oc,bcn->bon', wv, xf) + bv[None, :, None]      # (B, C, HW)
    energy = jnp.einsum('bci,bcj->bij', q, k)                      # (B, HW, HW)
    att = jax.nn.softmax(energy, axis=-1)
    out = jnp.einsum('bcj,bij->bci', v, att)                       # (B, C, HW)
    return gamma * out.reshape(B, C, H, W) + x


if __name__ == "__main__":
    B, C, H, W = 2, 32, 8, 8          # in_channels=32 -> query/key channels = 4
    C8 = C // 8

    key = jax.random.PRNGKey(0)
    ks = jax.random.split(key, 8)
    x = jax.random.normal(ks[0], (B, C, H, W), jnp.float32)
    wq = jax.random.normal(ks[1], (C8, C), jnp.float32) * 0.1   # Conv2d(C, C/8, 1)
    bq = jax.random.normal(ks[2], (C8,), jnp.float32) * 0.1
    wk = jax.random.normal(ks[3], (C8, C), jnp.float32) * 0.1   # Conv2d(C, C/8, 1)
    bk = jax.random.normal(ks[4], (C8,), jnp.float32) * 0.1
    wv = jax.random.normal(ks[5], (C, C), jnp.float32) * 0.1    # Conv2d(C, C, 1)
    bv = jax.random.normal(ks[6], (C,), jnp.float32) * 0.1
    # PyTorch init has gamma = 0 (output == x); use a nonzero value so the
    # attention path is actually exercised.
    gamma = jnp.array(0.5, jnp.float32)

    out = self_attention(x, wq, bq, wk, bk, wv, bv, gamma)
    jax.block_until_ready(out)

    ref = _reference(x, wq, bq, wk, bk, wv, bv, gamma)
    assert out.shape == x.shape and out.dtype == x.dtype
    max_err = float(jnp.max(jnp.abs(out - ref)))
    # bf16 MXU inputs + bf16 exp + approx reciprocal -> ~1e-2-level agreement
    # with the pure-f32 reference.
    assert jnp.allclose(out, ref, atol=2e-2, rtol=2e-2), f"max abs err {max_err}"
    print("KERNEL_OK")
</pallas_src>

<mosaic_0001>
module attributes {stable_mosaic.version = 11 : i64} {
  func.func @_self_attention_kernel(%arg0: i32, %arg1: i32, %arg2: memref<1x64x32xf32, #tpu.memory_space<vmem>>, %arg3: memref<32x128xbf16, #tpu.memory_space<vmem>>, %arg4: memref<1x128xf32, #tpu.memory_space<vmem>>, %arg5: memref<32x128xbf16, #tpu.memory_space<vmem>>, %arg6: memref<1x128xf32, #tpu.memory_space<vmem>>, %arg7: memref<32x33xbf16, #tpu.memory_space<vmem>>, %arg8: memref<1x33xf32, #tpu.memory_space<vmem>>, %arg9: memref<1x1xf32, #tpu.memory_space<smem>>, %arg10: memref<1x64x32xf32, #tpu.memory_space<vmem>>, %arg11: memref<64x128xbf16, #tpu.memory_space<vmem>>, %arg12: memref<64x128xbf16, #tpu.memory_space<vmem>>, %arg13: memref<64x33xbf16, #tpu.memory_space<vmem>>) attributes {dimension_semantics = [#tpu.dimension_semantics<parallel>, #tpu.dimension_semantics<arbitrary>], iteration_bounds = array<i64: 2, 1>, scalar_prefetch = 0 : i64, scratch_operands = 3 : i64, tpu.core_type = #tpu.core_type<tc>, window_params = [{transform_indices = @transform_0, window_bounds = array<i64: 1, 64, 32>}, {pipeline_mode = #tpu.pipeline_mode<synchronous>, transform_indices = @transform_1, window_bounds = array<i64: 32, 128>}, {pipeline_mode = #tpu.pipeline_mode<synchronous>, transform_indices = @transform_2, window_bounds = array<i64: 1, 128>}, {pipeline_mode = #tpu.pipeline_mode<synchronous>, transform_indices = @transform_3, window_bounds = array<i64: 32, 128>}, {pipeline_mode = #tpu.pipeline_mode<synchronous>, transform_indices = @transform_4, window_bounds = array<i64: 1, 128>}, {pipeline_mode = #tpu.pipeline_mode<synchronous>, transform_indices = @transform_5, window_bounds = array<i64: 32, 33>}, {pipeline_mode = #tpu.pipeline_mode<synchronous>, transform_indices = @transform_6, window_bounds = array<i64: 1, 33>}, {transform_indices = @transform_7, window_bounds = array<i64: 1, 1>}, {transform_indices = @transform_8, window_bounds = array<i64: 1, 64, 32>}]} {
    %c0_i32 = arith.constant 0 : i32
    %0 = arith.cmpi eq, %arg1, %c0_i32 : i32
    %1 = arith.extui %0 : i1 to i32
    %c0_i32_0 = arith.constant 0 : i32
    %2 = arith.cmpi ne, %1, %c0_i32_0 : i32
    scf.if %2 {
      %c0_i32_14 = arith.constant 0 : i32
      %c64_i32_15 = arith.constant 64 : i32
      %32 = arith.muli %c0_i32_14, %c64_i32_15 : i32
      %33 = tpu.assume_multiple %32, 64 : i32
      %c0_16 = arith.constant 0 : index
      %34 = arith.index_cast %33 : i32 to index
      %c0_17 = arith.constant 0 : index
      %35 = vector.load %arg2[%c0_16, %34, %c0_17] : memref<1x64x32xf32, #tpu.memory_space<vmem>>, vector<1x64x32xf32>
      %36 = vector.shape_cast %35 : vector<1x64x32xf32> to vector<64x32xf32>
      %37 = arith.truncf %36 : vector<64x32xf32> to vector<64x32xbf16>
      %c0_18 = arith.constant 0 : index
      %c0_19 = arith.constant 0 : index
      %38 = vector.load %arg3[%c0_18, %c0_19] : memref<32x128xbf16, #tpu.memory_space<vmem>>, vector<32x128xbf16>
      %cst_20 = arith.constant dense<0.000000e+00> : vector<64x128xf32>
      %39 = tpu.matmul %37, %38, %cst_20 {dimension_numbers = #tpu.dot_dimension_numbers<[1], [0], [0], [1], [0, 0, 1, 1], [], []>} : vector<64x32xbf16>, vector<32x128xbf16>, vector<64x128xf32> -> vector<64x128xf32>
      %c0_21 = arith.constant 0 : index
      %c0_22 = arith.constant 0 : index
      %40 = vector.load %arg4[%c0_21, %c0_22] : memref<1x128xf32, #tpu.memory_space<vmem>>, vector<1x128xf32>
      %41 = vector.broadcast %40 : vector<1x128xf32> to vector<64x128xf32>
      %42 = arith.addf %39, %41 : vector<64x128xf32>
      %43 = arith.truncf %42 : vector<64x128xf32> to vector<64x128xbf16>
      %44 = arith.index_cast %33 : i32 to index
      %c0_23 = arith.constant 0 : index
      %45 = vector.load %arg11[%44, %c0_23] : memref<64x128xbf16, #tpu.memory_space<vmem>>, vector<64x128xbf16>
      tpu.vector_store %arg11[%44, %c0_23], %43 {strides = array<i32>} : memref<64x128xbf16, #tpu.memory_space<vmem>>, vector<64x128xbf16>,
      %c0_24 = arith.constant 0 : index
      %c0_25 = arith.constant 0 : index
      %46 = vector.load %arg5[%c0_24, %c0_25] : memref<32x128xbf16, #tpu.memory_space<vmem>>, vector<32x128xbf16>
      %cst_26 = arith.constant dense<0.000000e+00> : vector<64x128xf32>
      %47 = tpu.matmul %37, %46, %cst_26 {dimension_numbers = #tpu.dot_dimension_numbers<[1], [0], [0], [1], [0, 0, 1, 1], [], []>} : vector<64x32xbf16>, vector<32x128xbf16>, vector<64x128xf32> -> vector<64x128xf32>
      %c0_27 = arith.constant 0 : index
      %c0_28 = arith.constant 0 : index
      %48 = vector.load %arg6[%c0_27, %c0_28] : memref<1x128xf32, #tpu.memory_space<vmem>>, vector<1x128xf32>
      %49 = vector.broadcast %48 : vector<1x128xf32> to vector<64x128xf32>
      %50 = arith.addf %47, %49 : vector<64x128xf32>
      %51 = arith.truncf %50 : vector<64x128xf32> to vector<64x128xbf16>
      %52 = arith.index_cast %33 : i32 to index
      %c0_29 = arith.constant 0 : index
      %53 = vector.load %arg12[%52, %c0_29] : memref<64x128xbf16, #tpu.memory_space<vmem>>, vector<64x128xbf16>
      tpu.vector_store %arg12[%52, %c0_29], %51 {strides = array<i32>} : memref<64x128xbf16, #tpu.memory_space<vmem>>, vector<64x128xbf16>,
      %c0_30 = arith.constant 0 : index
      %c0_31 = arith.constant 0 : index
      %54 = vector.load %arg7[%c0_30, %c0_31] : memref<32x33xbf16, #tpu.memory_space<vmem>>, vector<32x33xbf16>
      %cst_32 = arith.constant dense<0.000000e+00> : vector<64x33xf32>
      %55 = tpu.matmul %37, %54, %cst_32 {dimension_numbers = #tpu.dot_dimension_numbers<[1], [0], [0], [1], [0, 0, 1, 1], [], []>} : vector<64x32xbf16>, vector<32x33xbf16>, vector<64x33xf32> -> vector<64x33xf32>
      %c0_33 = arith.constant 0 : index
      %c0_34 = arith.constant 0 : index
      %56 = vector.load %arg8[%c0_33, %c0_34] : memref<1x33xf32, #tpu.memory_space<vmem>>, vector<1x33xf32>
      %57 = vector.broadcast %56 : vector<1x33xf32> to vector<64x33xf32>
      %58 = arith.addf %55, %57 : vector<64x33xf32>
      %59 = arith.truncf %58 : vector<64x33xf32> to vector<64x33xbf16>
      %60 = arith.index_cast %33 : i32 to index
      %c0_35 = arith.constant 0 : index
      %61 = vector.load %arg13[%60, %c0_35] : memref<64x33xbf16, #tpu.memory_space<vmem>>, vector<64x33xbf16>
      tpu.vector_store %arg13[%60, %c0_35], %59 {strides = array<i32>} : memref<64x33xbf16, #tpu.memory_space<vmem>>, vector<64x33xbf16>,
      %c1_i32 = arith.constant 1 : i32
    } else {
    }
    %c64_i32 = arith.constant 64 : i32
    %3 = arith.muli %arg1, %c64_i32 : i32
    %4 = tpu.assume_multiple %3, 64 : i32
    %5 = arith.index_cast %4 : i32 to index
    %c0 = arith.constant 0 : index
    %6 = vector.load %arg11[%5, %c0] : memref<64x128xbf16, #tpu.memory_space<vmem>>, vector<64x128xbf16>
    %c0_1 = arith.constant 0 : index
    %c0_2 = arith.constant 0 : index
    %7 = vector.load %arg12[%c0_1, %c0_2] : memref<64x128xbf16, #tpu.memory_space<vmem>>, vector<64x128xbf16>
    %cst = arith.constant dense<0.000000e+00> : vector<64x64xf32>
    %8 = tpu.matmul %6, %7, %cst {dimension_numbers = #tpu.dot_dimension_numbers<[1], [1], [0], [0], [0, 0, 1, 0], [], []>} : vector<64x128xbf16>, vector<64x128xbf16>, vector<64x64xf32> -> vector<64x64xf32>
    %cst_3 = arith.constant dense<0xFF800000> : vector<64xf32>
    %9 = vector.multi_reduction <maximumf>, %8, %cst_3 [1] : vector<64x64xf32> to vector<64xf32>
    %10 = vector.shape_cast %9 : vector<64xf32> to vector<64x1xf32>
    %11 = vector.broadcast %10 : vector<64x1xf32> to vector<64x64xf32>
    %12 = arith.subf %8, %11 : vector<64x64xf32>
    %13 = arith.truncf %12 : vector<64x64xf32> to vector<64x64xbf16>
    %14 = math.exp %13 : vector<64x64xbf16>
    %c0_4 = arith.constant 0 : index
    %c0_5 = arith.constant 0 : index
    %15 = vector.load %arg13[%c0_4, %c0_5] : memref<64x33xbf16, #tpu.memory_space<vmem>>, vector<64x33xbf16>
    %cst_6 = arith.constant dense<0.000000e+00> : vector<64x33xf32>
    %16 = tpu.matmul %14, %15, %cst_6 {dimension_numbers = #tpu.dot_dimension_numbers<[1], [0], [0], [1], [0, 0, 1, 1], [], []>} : vector<64x64xbf16>, vector<64x33xbf16>, vector<64x33xf32> -> vector<64x33xf32>
    %17 = vector.extract_strided_slice %16 {offsets = [0, 0], sizes = [64, 32], strides = [1, 1]} : vector<64x33xf32> to vector<64x32xf32>
    %18 = vector.extract_strided_slice %16 {offsets = [0, 32], sizes = [64, 1], strides = [1, 1]} : vector<64x33xf32> to vector<64x1xf32>
    %19 = tpu.reciprocal %18 {approx = true} : vector<64x1xf32> -> vector<64x1xf32>
    %c0_7 = arith.constant 0 : index
    %20 = arith.index_cast %4 : i32 to index
    %c0_8 = arith.constant 0 : index
    %21 = vector.load %arg2[%c0_7, %20, %c0_8] : memref<1x64x32xf32, #tpu.memory_space<vmem>>, vector<1x64x32xf32>
    %22 = vector.shape_cast %21 : vector<1x64x32xf32> to vector<64x32xf32>
    %c0_9 = arith.constant 0 : index
    %c0_10 = arith.constant 0 : index
    %23 = memref.load %arg9[%c0_9, %c0_10] : memref<1x1xf32, #tpu.memory_space<smem>>
    %24 = vector.broadcast %19 : vector<64x1xf32> to vector<64x32xf32>
    %25 = arith.mulf %17, %24 : vector<64x32xf32>
    %26 = vector.broadcast %23 : f32 to vector<64x32xf32>
    %27 = arith.mulf %26, %25 : vector<64x32xf32>
    %28 = arith.addf %27, %22 : vector<64x32xf32>
    %c0_11 = arith.constant 0 : index
    %c0_12 = arith.constant 0 : index
    %c0_13 = arith.constant 0 : index
    %29 = vector.load %arg10[%c0_11, %c0_12, %c0_13] : memref<1x64x32xf32, #tpu.memory_space<vmem>>, vector<1x64x32xf32>
    %30 = vector.shape_cast %29 : vector<1x64x32xf32> to vector<64x32xf32>
    %31 = vector.shape_cast %28 : vector<64x32xf32> to vector<1x64x32xf32>
    tpu.vector_store %arg10[%c0_11, %c0_12, %c0_13], %31 {strides = array<i32>} : memref<1x64x32xf32, #tpu.memory_space<vmem>>, vector<1x64x32xf32>,
    return
  }
  func.func @transform_0(%arg0: i32, %arg1: i32) -> (i32, i32, i32) {
    %c0_i32 = arith.constant 0 : i32
    %c0_i32_0 = arith.constant 0 : i32
    %c0_i32_1 = arith.constant 0 : i32
    return %arg0, %c0_i32, %c0_i32_0 : i32, i32, i32
  }
  func.func @transform_1(%arg0: i32, %arg1: i32) -> (i32, i32) {
    %c0_i32 = arith.constant 0 : i32
    %c0_i32_0 = arith.constant 0 : i32
    %c0_i32_1 = arith.constant 0 : i32
    return %c0_i32, %c0_i32_0 : i32, i32
  }
  func.func @transform_2(%arg0: i32, %arg1: i32) -> (i32, i32) {
    %c0_i32 = arith.constant 0 : i32
    %c0_i32_0 = arith.constant 0 : i32
    %c0_i32_1 = arith.constant 0 : i32
    return %c0_i32, %c0_i32_0 : i32, i32
  }
  func.func @transform_3(%arg0: i32, %arg1: i32) -> (i32, i32) {
    %c0_i32 = arith.constant 0 : i32
    %c0_i32_0 = arith.constant 0 : i32
    %c0_i32_1 = arith.constant 0 : i32
    return %c0_i32, %c0_i32_0 : i32, i32
  }
  func.func @transform_4(%arg0: i32, %arg1: i32) -> (i32, i32) {
    %c0_i32 = arith.constant 0 : i32
    %c0_i32_0 = arith.constant 0 : i32
    %c0_i32_1 = arith.constant 0 : i32
    return %c0_i32, %c0_i32_0 : i32, i32
  }
  func.func @transform_5(%arg0: i32, %arg1: i32) -> (i32, i32) {
    %c0_i32 = arith.constant 0 : i32
    %c0_i32_0 = arith.constant 0 : i32
    %c0_i32_1 = arith.constant 0 : i32
    return %c0_i32, %c0_i32_0 : i32, i32
  }
  func.func @transform_6(%arg0: i32, %arg1: i32) -> (i32, i32) {
    %c0_i32 = arith.constant 0 : i32
    %c0_i32_0 = arith.constant 0 : i32
    %c0_i32_1 = arith.constant 0 : i32
    return %c0_i32, %c0_i32_0 : i32, i32
  }
  func.func @transform_7(%arg0: i32, %arg1: i32) -> (i32, i32) {
    %c0_i32 = arith.constant 0 : i32
    %c0_i32_0 = arith.constant 0 : i32
    %c0_i32_1 = arith.constant 0 : i32
    return %c0_i32, %c0_i32_0 : i32, i32
  }
  func.func @transform_8(%arg0: i32, %arg1: i32) -> (i32, i32, i32) {
    %c0_i32 = arith.constant 0 : i32
    %c0_i32_0 = arith.constant 0 : i32
    return %arg0, %arg1, %c0_i32 : i32, i32, i32
  }
}

</mosaic_0001>

<bundles_post_ra>
// kernel: self_attention.1
= control target key start
LH: loop header
LB: loop body
LE: loop exit
PB: predicated region body
PF: predicated region fallthrough
CT: control target
= control target key end

     0   :  { %s2318_s0 = inlined_call_operand.hbm [shape: f32[2,64,32], index: 0, kind: input, shape index: {}]   ;;  %s2319_s1 = inlined_call_operand.hbm [shape: bf16[32,128], index: 1, kind: input, shape index: {}]   ;;  %s2320_s2 = inlined_call_operand.hbm [shape: f32[1,128], index: 2, kind: input, shape index: {}]   ;;  %s2321_s3 = inlined_call_operand.hbm [shape: bf16[32,128], index: 3, kind: input, shape index: {}]   ;;  %s2322_s4 = inlined_call_operand.hbm [shape: f32[1,128], index: 4, kind: input, shape index: {}]   ;;  %s2323_s5 = inlined_call_operand.hbm [shape: bf16[32,33], index: 5, kind: input, shape index: {}]   ;;  %s2324_s6 = inlined_call_operand.hbm [shape: f32[1,33], index: 6, kind: input, shape index: {}]   ;;  %s2325_s7 = inlined_call_operand.<no memory space> [shape: f32[1,1], index: 7, kind: input, shape index: {}]   ;;  %s2326_s8 = inlined_call_operand.hbm [shape: f32[2,64,32], index: 8, kind: output, shape index: {}]  }
   0x1   :  { %2333 = sst [smem:[#allocation24_spill]] %s2319_s1 }
   0x2   :  { %2334 = sst [smem:[#allocation25_spill]] %s2326_s8 }
   0x3   :  { %13 = sst [smem:[#allocation5]] %s2325_s7 }
   0x4   :  { %14 = vsyncpa [#allocation7], 0 }
   0x5   :  { %16 = vsyncpa [#allocation7 + $0x1], 0 }
   0x6   :  { %17 = vsyncpa [#allocation10], 0 }
   0x7   :  { %18 = vsyncpa [#allocation13], 0 }
   0x8   :  { %19 = vsyncpa [#allocation16], 0 }
   0x9   :  { %20 = vsyncpa [#allocation8], 0 }
   0xa   :  { %22 = vsyncpa [#allocation8 + $0x1], 0  ;;  %s1876_s29 = smov 0   ;;  %s1878_s30 = smov 0  }
   0xb   :  { %s1880_s9 = smov 0   ;;  %s1882_s10 = smov 0  }
   0xc   :  { %s1884_s11 = smov 0   ;;  %s1886_s12 = smov 0  }
   0xd LB: > { %s2327_s7 = sadd.s32 4294967295, %s1811_s12   ;;  %p1203_p0 = scmp.ge.s32.totalorder %s1811_s12, 1  ;;  %s1811_s12 = sphi %s1886_s12, %s28_s12   ;;  %s1807_s11 = sphi %s1884_s11, %s2357_s11   ;;  %s1803_s10 = sphi %s1882_s10, %s2356_s10   ;;  %s1799_s9 = sphi %s1880_s9, %s2355_s9   ;;  %s1795_s30 = sphi %s1878_s30, %s2354_s30   ;;  %s1791_s29 = sphi %s1876_s29, %s2353_s29  }
   0xe   : > { %p1910_p1 = scmp.eq.s32.totalorder %s2327_s7, 0  ;;  %p246_p2 = scmp.lt.s32.totalorder %s1811_s12, 3 }
   0xf   : > { %s1813_s15 = smov [#allocation9]   ;;  %s1814_s18 = smov [#allocation12]  }
  0x10   : > { %s2335_s13 = scalar_select %p1910_p1, 1, 0 }
  0x11   : > { %p1915_p3 = pnand %p1203_p0, %p246_p2  ;;  %s258_s16 = sshll.u32 %s1813_s15, 4  ;;  %s1919_s16 = int_to_ptr.vmem [resolvable:$true] %s258_s16 }
  0x12   : > { %s282_s19 = sshll.u32 %s1814_s18, 4  ;;  %s1815_s20 = smov [#allocation15]   ;;  %s1930_s19 = int_to_ptr.vmem [resolvable:$true] %s282_s19 }
  0x13   : > { %s2336_s14 = scalar_select %p1915_p3, 1, 0 }
  0x14   : > { %p1385_p4 = pneg %p1915_p3  ;;  %s1932_s21 = sshll.u32 %s1815_s20, 4  ;;  %s307_s21 = int_to_ptr.vmem [resolvable:$true] %s1932_s21 }
  0x15   : > { %s2338_s1 = sld [smem:[#allocation24_spill]] }
  0x16   : > { %p1926_p6 = pnand %p1385_p4, %p1910_p1 }
  0x18   : > { %p1942_p8 = pneg %p1926_p6 }
  0x1b   : > { %s1519_s24 = scalar_lea.hbm %s2338_s1, 256 }
  0x1c   : > { %p1520_p7 = scmp.ne.s32.totalorder %s2338_s1, %s1519_s24  ;;  %p1526_p11 = scmp.lt.u32.totalorder %s1519_s24, %s2338_s1 }
  0x1e   : > { %p1522_p9 = pnand %p1942_p8, %p1520_p7 }
  0x20   : > { %p1523_p10 = pneg %p1522_p9 }
  0x22   : > { %p1528_p12 = pnand %p1526_p11, %p1523_p10 }
  0x24   : > { %1531 = shalt.err (!%p1528_p12)
}
  0x25   : > { %s1532_s18 = scalar_lea.vmem %s1919_s16, 256  ;;  %p1540_p4 = scmp.lt.s32.totalorder %s1919_s16, %s1919_s16 }
  0x26   : > { %p1533_p13 = scmp.ne.s32.totalorder %s1919_s16, %s1532_s18  ;;  %p1541_p5 = scmp.lt.s32.totalorder %s1532_s18, %s1532_s18 }
  0x28   : > { %p1535_p0 = pnand %p1533_p13, %p1942_p8  ;;  %p1542_p7 = por %p1541_p5, %p1540_p4 }
  0x2a   : > { %p1536_p2 = pneg %p1535_p0 }
  0x2c   : > { %p1543_p9 = pnand %p1542_p7, %p1536_p2 }
  0x2e   : > { %1546 = shalt.err (!%p1543_p9)
}
  0x2f   : > { %s1816_s20 = smov 64   ;;  %s1817_s22 = smov 4  }
  0x30   : > { %1388 = dma.hbm_to_vmem [thread:$0]  (!%p1926_p6), %s2338_s1, 256, %s1919_s16, [#allocation10], %s1816_s20, %s1816_s20, %s1817_s22  }
  0x31   : > { %s1547_s28 = scalar_lea.hbm %s2321_s3, 256 }
  0x32   : > { %p1548_p5 = scmp.ne.s32.totalorder %s2321_s3, %s1547_s28  ;;  %p1554_p12 = scmp.lt.u32.totalorder %s1547_s28, %s2321_s3 }
  0x34   : > { %p1550_p10 = pnand %p1548_p5, %p1942_p8 }
  0x36   : > { %p1551_p11 = pneg %p1550_p10 }
  0x38   : > { %p1556_p13 = pnand %p1554_p12, %p1551_p11 }
  0x3a   : > { %1559 = shalt.err (!%p1556_p13)
}
  0x3b   : > { %s1560_s16 = scalar_lea.vmem %s1930_s19, 256  ;;  %p1568_p7 = scmp.lt.s32.totalorder %s1930_s19, %s1930_s19 }
  0x3c   : > { %p1561_p0 = scmp.ne.s32.totalorder %s1930_s19, %s1560_s16  ;;  %p1569_p9 = scmp.lt.s32.totalorder %s1560_s16, %s1560_s16 }
  0x3e   : > { %p1563_p2 = pnand %p1561_p0, %p1942_p8  ;;  %p1570_p5 = por %p1569_p9, %p1568_p7 }
  0x40   : > { %p1564_p4 = pneg %p1563_p2 }
  0x42   : > { %p1571_p10 = pnand %p1570_p5, %p1564_p4 }
  0x44   : > { %1574 = shalt.err (!%p1571_p10)
}
  0x45   : > { %1394 = dma.hbm_to_vmem [thread:$0]  (!%p1926_p6), %s2321_s3, 256, %s1930_s19, [#allocation13], %s1816_s20, %s1816_s20, %s1817_s22  }
  0x46   : > { %s1575_s25 = scalar_lea.hbm %s2323_s5, 256 }
  0x47   : > { %p1576_p11 = scmp.ne.s32.totalorder %s2323_s5, %s1575_s25  ;;  %p1582_p0 = scmp.lt.u32.totalorder %s1575_s25, %s2323_s5 }
  0x49   : > { %p1578_p12 = pnand %p1576_p11, %p1942_p8 }
  0x4b   : > { %p1579_p13 = pneg %p1578_p12 }
  0x4d   : > { %p1584_p2 = pnand %p1582_p0, %p1579_p13 }
  0x4f   : > { %1587 = shalt.err (!%p1584_p2)
}
  0x50   : > { %s1588_s16 = scalar_lea.vmem %s307_s21, 256  ;;  %p1596_p5 = scmp.lt.s32.totalorder %s307_s21, %s307_s21 }
  0x51   : > { %p1589_p4 = scmp.ne.s32.totalorder %s307_s21, %s1588_s16  ;;  %p1597_p10 = scmp.lt.s32.totalorder %s1588_s16, %s1588_s16 }
  0x53   : > { %p1591_p7 = pnand %p1589_p4, %p1942_p8  ;;  %p1598_p3 = por %p1597_p10, %p1596_p5 }
  0x55   : > { %p1592_p9 = pneg %p1591_p7 }
  0x57   : > { %p1599_p1 = pnand %p1598_p3, %p1592_p9 }
  0x59   : > { %1602 = shalt.err (!%p1599_p1)
}
  0x5a   : > { %1400 = dma.hbm_to_vmem [thread:$0]  (!%p1926_p6), %s2323_s5, 256, %s307_s21, [#allocation16], %s1816_s20, %s1816_s20, %s1817_s22  }
  0x5b   : > { %s1818_s7 = smov [#allocation11]   ;;  %s1819_s24 = smov [#allocation14]  }
  0x5c   : > { %s272_s23 = sshll.u32 %s1818_s7, 4  ;;  %s296_s25 = sshll.u32 %s1819_s24, 4  ;;  %s273_s23 = int_to_ptr.vmem [resolvable:$true] %s272_s23  ;;  %s297_s25 = int_to_ptr.vmem [resolvable:$true] %s296_s25 }
  0x5d   : > { %s1603_s15 = scalar_lea.hbm %s2320_s2, 16 }
  0x5e   : > { %p1604_p1 = scmp.ne.s32.totalorder %s2320_s2, %s1603_s15  ;;  %p1610_p12 = scmp.lt.u32.totalorder %s1603_s15, %s2320_s2 }
  0x60   : > { %p1606_p3 = pnand %p1604_p1, %p1942_p8 }
  0x62   : > { %p1607_p11 = pneg %p1606_p3 }
  0x64   : > { %p1612_p13 = pnand %p1610_p12, %p1607_p11 }
  0x66   : > { %1615 = shalt.err (!%p1612_p13)
}
  0x67   : > { %s1616_s21 = scalar_lea.vmem %s273_s23, 16  ;;  %s1623_s20 = scalar_lea.vmem %s273_s23, 32 }
  0x68   : > { %p1617_p0 = scmp.ne.s32.totalorder %s273_s23, %s1616_s21  ;;  %p1624_p7 = scmp.lt.s32.totalorder %s273_s23, %s273_s23 }
  0x69   : > { %p1625_p9 = scmp.lt.s32.totalorder %s1623_s20, %s1616_s21 }
  0x6a   : > { %p1619_p2 = pnand %p1617_p0, %p1942_p8 }
  0x6b   : > { %p1626_p5 = por %p1625_p9, %p1624_p7 }
  0x6c   : > { %p1620_p4 = pneg %p1619_p2 }
  0x6e   : > { %p1627_p10 = pnand %p1626_p5, %p1620_p4 }
  0x70   : > { %1630 = shalt.err (!%p1627_p10)
}
  0x71   : > { %1391 = dma.hbm_to_vmem [thread:$0]  (!%p1926_p6), %s2320_s2, 16, %s273_s23, [#allocation10]  }
  0x72   : > { %s1631_s24 = scalar_lea.hbm %s2322_s4, 16 }
  0x73   : > { %p1632_p1 = scmp.ne.s32.totalorder %s2322_s4, %s1631_s24  ;;  %p1638_p12 = scmp.lt.u32.totalorder %s1631_s24, %s2322_s4 }
  0x75   : > { %p1634_p3 = pnand %p1632_p1, %p1942_p8 }
  0x77   : > { %p1635_p11 = pneg %p1634_p3 }
  0x79   : > { %p1640_p13 = pnand %p1638_p12, %p1635_p11 }
  0x7b   : > { %1643 = shalt.err (!%p1640_p13)
}
  0x7c   : > { %s1644_s16 = scalar_lea.vmem %s297_s25, 16  ;;  %s1651_s23 = scalar_lea.vmem %s297_s25, 32 }
  0x7d   : > { %p1645_p0 = scmp.ne.s32.totalorder %s297_s25, %s1644_s16  ;;  %p1652_p7 = scmp.lt.s32.totalorder %s297_s25, %s297_s25 }
  0x7e   : > { %p1653_p9 = scmp.lt.s32.totalorder %s1651_s23, %s1644_s16 }
  0x7f   : > { %p1647_p2 = pnand %p1645_p0, %p1942_p8 }
  0x80   : > { %p1654_p5 = por %p1653_p9, %p1652_p7 }
  0x81   : > { %p1648_p4 = pneg %p1647_p2 }
  0x83   : > { %p1655_p10 = pnand %p1654_p5, %p1648_p4 }
  0x85   : > { %1658 = shalt.err (!%p1655_p10)
}
  0x86   : > { %1397 = dma.hbm_to_vmem [thread:$0]  (!%p1926_p6), %s2322_s4, 16, %s297_s25, [#allocation13]  }
  0x87   : > { %s1820_s20 = smov [#allocation17]   ;;  %s1659_s7 = scalar_lea.hbm %s2324_s6, 16 }
  0x88   : > { %s320_s22 = sshll.u32 %s1820_s20, 4  ;;  %p1660_p1 = scmp.ne.s32.totalorder %s2324_s6, %s1659_s7  ;;  %s321_s22 = int_to_ptr.vmem [resolvable:$true] %s320_s22 }
  0x89   : > { %p1666_p12 = scmp.lt.u32.totalorder %s1659_s7, %s2324_s6 }
  0x8a   : > { %p1662_p3 = pnand %p1660_p1, %p1942_p8 }
  0x8c   : > { %p1663_p11 = pneg %p1662_p3 }
  0x8e   : > { %p1668_p13 = pnand %p1666_p12, %p1663_p11 }
  0x90   : > { %1671 = shalt.err (!%p1668_p13)
}
  0x91   : > { %s1672_s25 = scalar_lea.vmem %s321_s22, 16  ;;  %s1679_s18 = scalar_lea.vmem %s321_s22, 32 }
  0x92   : > { %p1673_p0 = scmp.ne.s32.totalorder %s321_s22, %s1672_s25  ;;  %p1680_p7 = scmp.lt.s32.totalorder %s321_s22, %s321_s22 }
  0x93   : > { %p1681_p9 = scmp.lt.s32.totalorder %s1679_s18, %s1672_s25 }
  0x94   : > { %p1675_p2 = pnand %p1673_p0, %p1942_p8 }
  0x95   : > { %p1682_p5 = por %p1681_p9, %p1680_p7 }
  0x96   : > { %p1676_p4 = pneg %p1675_p2 }
  0x98   : > { %p1683_p10 = pnand %p1682_p5, %p1676_p4 }
  0x9a   : > { %1686 = shalt.err (!%p1683_p10)
}
  0x9b   : > { %1403 = dma.hbm_to_vmem [thread:$0]  (!%p1926_p6), %s2324_s6, 16, %s321_s22, [#allocation16]  }
  0x9c   : > { %s1202_s27 = sadd.s32 4294967294, %s1811_s12   ;;  %s40_s19 = sadd.s32 1, %s1807_s11 }
  0x9d   : > { %p42_p8 = scmp.ge.s32.totalorder %s40_s19, 2  ;;  %s47_s17 = sadd.s32 1, %s1799_s9 }
  0x9e   : > { %p54_p1 = scmp.ne.s32.totalorder %s1799_s9, %s1795_s30  ;;  %p55_p3 = scmp.eq.s32.totalorder %s1811_s12, 0 }
  0x9f   : > { %s2359_s19 = smov (%p42_p8, %s40_s19), 0  ;;  %p60_p12 = scmp.ne.s32.totalorder %s1795_s30, %s1791_s29 }
  0xa0   : > { %p2076_p11 = por %p55_p3, %p54_p1  ;;  %s44_s20 = ssub.s32 %s1807_s11, %s2359_s19 }
  0xa1   : > { %s2341_s22 = sadd.s32 4294967295, %s1811_s12   ;;  %p45_p13 = scmp.eq.s32.totalorder %s44_s20, 0 }
  0xa2   : > { %p233_p6 = scmp.eq.s32.totalorder %s2341_s22, 1  ;;  %p2342_p0 = scmp.ne.s32.totalorder %s2335_s13, 0 }
  0xa3   : > { %p239_p7 = scmp.eq.s32.totalorder %s1202_s27, 1  ;;  %p1418_p5 = scmp.lt.s32.totalorder %s1811_s12, 2 }
  0xa4   : > { %p2088_p2 = por %p2342_p0, %p60_p12  ;;  %p2092_p4 = por %p233_p6, %p54_p1 }
  0xa5   : > { %s2097_s7 = scalar_select %p45_p13, %s1799_s9, %s47_s17  }
  0xa6   : > { %s2344_s1 = scalar_select %p2092_p4, 1, 0 }
  0xa7   : > { %p2099_p9 = por %p239_p7, %p60_p12  ;;  %s334_s26 = sand.u32 1, %s1799_s9  }
  0xa8   : > { %s1253_s28 = sshll.u32 %s1807_s11, 10  ;;  %s1211_s15 = sshll.u32 %s334_s26, 6 }
  0xa9   : > { %s2345_s24 = scalar_select %p2099_p9, 1, 0 }
  0xaa   : > { %s2109_s16 = scalar_lea.hbm %s2318_s0, %s1253_s28  ;;  %s338_s23 = scalar_lea.vmem [#allocation6], %s1211_s15 }
  0xab   : > { %s345_s27 = sshll.u32 %s338_s23, 4  ;;  %p2113_p10 = pnand %p1418_p5, %p2076_p11  ;;  %s2117_s27 = int_to_ptr.vmem [resolvable:$true] %s345_s27 }
  0xac   : > { %s2119_s20 = scalar_lea.sflag [#allocation7], %s334_s26  ;;  %s1687_s22 = scalar_lea.hbm %s2109_s16, 1024 }
  0xad   : > { %p1688_p8 = scmp.ne.s32.totalorder %s2109_s16, %s1687_s22  ;;  %p1689_p1 = pneg %p2113_p10 }
  0xae   : > { %s1692_s15 = scalar_lea.hbm %s2318_s0, 2048  ;;  %p1693_p11 = scmp.lt.u32.totalorder %s2109_s16, %s2318_s0 }
  0xaf   : > { %p1690_p3 = pnand %p1689_p1, %p1688_p8  ;;  %p1694_p6 = scmp.lt.u32.totalorder %s1692_s15, %s1687_s22 }
  0xb0   : > { %p1696_p0 = scmp.lt.u32.totalorder %s1687_s22, %s2109_s16 }
  0xb1   : > { %p1691_p12 = pneg %p1690_p3  ;;  %p1695_p13 = por %p1694_p6, %p1693_p11 }
  0xb3   : > { %p1697_p7 = por %p1696_p0, %p1695_p13 }
  0xb5   : > { %p1698_p5 = pnand %p1697_p7, %p1691_p12 }
  0xb7   : > { %1701 = shalt.err (!%p1698_p5)
}
  0xb8   : > { %s1702_s26 = scalar_lea.vmem %s2117_s27, 1024  ;;  %s1821_s23 = smov [#allocation6]  }
  0xb9   : > { %p1703_p8 = scmp.ne.s32.totalorder %s2117_s27, %s1702_s26  ;;  %s1707_s28 = sshll.u32 %s1821_s23, 4  ;;  %s1708_s28 = int_to_ptr.vmem [resolvable:$false] %s1707_s28 }
  0xba   : > { %s1709_s21 = scalar_lea.vmem %s1708_s28, 2048  ;;  %p1710_p4 = scmp.lt.s32.totalorder %s2117_s27, %s1708_s28 }
  0xbb   : > { %p1705_p3 = pnand %p1703_p8, %p1689_p1  ;;  %p1711_p11 = scmp.lt.s32.totalorder %s1709_s21, %s1702_s26 }
  0xbd   : > { %p1706_p9 = pneg %p1705_p3  ;;  %p1712_p6 = por %p1711_p11, %p1710_p4 }
  0xbf   : > { %p1713_p13 = pnand %p1712_p6, %p1706_p9 }
  0xc1   : > { %1716 = shalt.err (!%p1713_p13)
}
  0xc2   : > { %s1822_s22 = smov 128   ;;  %s1823_s15 = smov 8  }
  0xc3   : > { %1407 = dma.hbm_to_vmem [thread:$0]  (!%p2113_p10), %s2109_s16, 1024, %s2117_s27, %s2119_s20, %s1822_s22, %s1822_s22, %s1823_s15  }
  0xc4   : > { %p2347_p1 = scmp.ne.s32.totalorder %s2336_s14, 0 }
  0xc5   : > { %s2150_s25 = sand.u32 (!%p2347_p1), 1, %s1795_s30  }
  0xc6   : > { %357 = sbr.rel (%p2347_p1) target bundleno = 1248 (0x4e0), region = 52  ;;  %s1215_s18 = sshll.u32 (!%p2347_p1), %s2150_s25, 6 }
  0xc7   : > { %s360_s26 = scalar_lea.sflag (!%p2347_p1), [#allocation7], %s2150_s25  ;;  %s2156_s23 = scalar_lea.vmem (!%p2347_p1), [#allocation6], %s1215_s18 }
  0xcd   : > { %1770 = dma.done.wait (%p2088_p2), %s360_s26, 1024  }
  0xce   : > { %1772 = vsyncadd (%p2088_p2), %s360_s26, 4294966272  ;;  %p2348_p4 = scmp.ne.s32.totalorder %s2335_s13, 0 }
  0xd0   : > { %1774 = dma.done.wait (%p2348_p4), [#allocation10], 272  }
  0xd1   : > { %1776 = vsyncadd (%p2348_p4), [#allocation10], 4294967024 }
  0xd2   : > { %1778 = dma.done.wait (%p2348_p4), [#allocation13], 272  }
  0xd3   : > { %1780 = vsyncadd (%p2348_p4), [#allocation13], 4294967024 }
  0xd4   : > { %1782 = dma.done.wait (%p2348_p4), [#allocation16], 272  }
  0xd5   : > { %1784 = vsyncadd (%p2348_p4), [#allocation16], 4294967024  ;;  %v1489_v0 = vld [vmem:[#allocation12] sm:$0xff]   ;;  %v1490_v1 = vld [vmem:[#allocation12 + $0x8] sm:$0xff]   ;;  %vm461_vm0 = vcmask 261120   ;;  %vm735_vm1 = vcmask 269312  }
  0xd6   : > { %1301 = vmatprep.subr.bf16.mxu1 %v1489_v0  ;;  %v2175_v2 = vld [vmem:[%s2156_s23] sm:$0xff]  ;;  %v2178_v3 = vld [vmem:[%s2156_s23 + $0x8] sm:$0xff]  ;;  %v2183_v5 = vld [vmem:[%s2156_s23 + $0x10] sm:$0xff]  ;;  %vm818_vm2 = vcmask 523264   ;;  %s965_s13 = sld [smem:[#allocation5]]  ;;  %s2238_s14 = scalar_lea.vmem [#allocation18], %s1215_s18 }
  0xd7   : > { %1302 = vmatpush3.bf16.msra.mxu1 %v1489_v0  ;;  %v434_v4 = vpack.c.bf16 %v2178_v3, %v2175_v2  ;;  %v2186_v6 = vld [vmem:[%s2156_s23 + $0x18] sm:$0xff]  ;;  %v2189_v7 = vld [vmem:[%s2156_s23 + $0x20] sm:$0xff]  ;;  %v2192_v8 = vld [vmem:[%s2156_s23 + $0x28] sm:$0xff]  ;;  %s1254_s8 = sshll.u32 %s1803_s10, 10  ;;  %s1056_s16 = sshll.u32 %s2238_s14, 4  ;;  %s2266_s16 = int_to_ptr.vmem [resolvable:$true] %s1056_s16 }
  0xd8   : > { %1303 = vmatprep.subr.bf16.mxu1 %v1490_v1  ;;  %v1491_v9 = vld [vmem:[#allocation9] sm:$0xff]   ;;  %v435_v10 = vpack.c.bf16 %v2186_v6, %v2183_v5  ;;  %v1492_v11 = vld [vmem:[#allocation9 + $0x8] sm:$0xff]   ;;  %v436_v12 = vpack.c.bf16 %v2192_v8, %v2189_v7  ;;  %v2203_v13 = vld [vmem:[%s2156_s23 + $0x30] sm:$0xff]  ;;  %s2349_s20 = sld [smem:[#allocation25_spill]]  ;;  %s1041_s21 = scalar_lea.sflag [#allocation8], %s2150_s25 }
  0xd9   : > { %1305 = vmatprep.mubr.msk.bf16.mxu1 %vm461_vm0, %v434_v4  ;;  %1293 = vmatprep.mubr.msk.bf16.mxu0 %vm461_vm0, %v434_v4  ;;  %v2206_v14 = vld [vmem:[%s2156_s23 + $0x38] sm:$0xff]  ;;  %v1493_v16 = vld [vmem:[#allocation15] sm:$0xff]   ;;  %v1494_v17 = vld [vmem:[#allocation15 + $0x8] sm:$0xff]   ;;  %s1717_s10 = scalar_lea.vmem %s2266_s16, 1024  ;;  %p2350_p9 = scmp.ne.s32.totalorder %s2344_s1, 0 }
  0xda   : > { %1289 = vmatprep.subr.bf16.mxu0 %v1491_v9  ;;  %v437_v15 = vpack.c.bf16 %v2206_v14, %v2203_v13  ;;  %v1230_v19 = vld [vmem:[#allocation14] ss:$0 sm:$0xff]  ;;  %v1223_v25 = vld [vmem:[#allocation11] ss:$0 sm:$0xff]  ;;  %v1237_v60 = vld [vmem:[#allocation17] ss:$0 sm:$0xff]  ;;  %p1718_p2 = scmp.ne.s32.totalorder %s2266_s16, %s1717_s10 }
  0xdb   : > { %1304 = vmatpush3.bf16.msra.mxu1 %v1490_v1  ;;  %1290 = vmatpush3.bf16.msra.mxu0 %v1491_v9  ;;  %s1825_s22 = smov [#allocation18]  }
  0xdc   : > { %1291 = vmatprep.subr.bf16.mxu0 %v1492_v11  ;;  %p1719_p10 = pnand %p1718_p2, %p2350_p9  ;;  %s1721_s15 = sshll.u32 %s1825_s22, 4  ;;  %s1722_s15 = int_to_ptr.vmem [resolvable:$false] %s1721_s15 }
  0xdd   : > { %s1723_s18 = scalar_lea.vmem %s1722_s15, 2048  ;;  %p1724_p0 = scmp.lt.s32.totalorder %s2266_s16, %s1722_s15 }
  0xde   : > { %1306 = vmatmul.mubr.msk.bf16.vlgmr.msra.gmra.mrb[0].mxu1 %vm461_vm0, %v435_v10  ;;  %s2264_s28 = scalar_lea.hbm %s2349_s20, %s1254_s8  ;;  %p1720_p12 = pneg %p1719_p10 }
  0xdf   : > { %1309 = vmatprep.mubr.msk.bf16.mxu1 %vm461_vm0, %v436_v12  ;;  %1292 = vmatpush3.bf16.msra.mxu0 %v1492_v11  ;;  %p1725_p7 = scmp.lt.s32.totalorder %s1723_s18, %s1717_s10 }
  0xe0   : > { %1313 = vmatprep.subr.bf16.mxu0 %v1493_v16 }
  0xe1   : > { %p1726_p5 = por %p1725_p7, %p1724_p0 }
  0xe2   : > { %1294 = vmatmul.mubr.msk.bf16.vlgmr.msra.gmra.mrb[0].mxu0 %vm461_vm0, %v435_v10 }
  0xe3   : > { %1297 = vmatprep.mubr.msk.bf16.mxu0 %vm461_vm0, %v436_v12  ;;  %1314 = vmatpush3.bf16.msra.mxu0 %v1493_v16  ;;  %p1727_p8 = pnand %p1726_p5, %p1720_p12 }
  0xe4   : > { %1315 = vmatprep.subr.bf16.mxu0 %v1494_v17 }
  0xe6   : > { %1310 = vmatmul.mubr.msk.bf16.gmra.mrb[4].mxu1 %vm461_vm0, %v437_v15 }
  0xe7   : > { %1316 = vmatpush3.bf16.msra.mxu0 %v1494_v17 }
  0xea   : > { %1298 = vmatmul.mubr.msk.bf16.gmra.mrb[4].mxu0 %vm461_vm0, %v437_v15 }
  0xeb   : > { %1317 = vmatprep.mubr.msk.bf16.mxu0 %vm461_vm0, %v434_v4 }
  0xf2   : > { %1318 = vmatmul.mubr.msk.bf16.vlgmr.msra.gmra.mrb[8].mxu0 %vm461_vm0, %v435_v10 }
  0xf3   : > { %1321 = vmatprep.mubr.msk.bf16.mxu0 %vm461_vm0, %v436_v12 }
  0xfa   : > { %1322 = vmatmul.mubr.msk.bf16.gmra.mrb[12].mxu0 %vm461_vm0, %v437_v15 }
 0x1b1   : > { %v1307_v18 = vpop.f32.mrb[0].mxu1 }
 0x1b2   : > { %v604_v20 = vpop.f32.mrb[1].mxu1  ;;  %v613_v22 = vadd.f32 %v1307_v18, %v1230_v19 }
 0x1b3   : > { %v1308_v21 = vpop.f32.mrb[2].mxu1  ;;  %v605_v26 = vadd.f32 %v1230_v19, %v604_v20 }
 0x1b4   : > { %v616_v23 = vadd.f32 %v1308_v21, %v1230_v19  ;;  %v607_v24 = vpop.f32.mrb[3].mxu1 }
 0x1b5   : > { %v608_v27 = vadd.f32 %v1230_v19, %v607_v24  ;;  %v1295_v29 = vpop.f32.mrb[0].mxu0 }
 0x1b6   : > { %v636_v28 = vpack.c.bf16 %v616_v23, %v613_v22  ;;  %v517_v31 = vadd.f32 %v1295_v29, %v1223_v25  ;;  %v508_v32 = vpop.f32.mrb[1].mxu0 }
 0x1b7   : > { %v635_v30 = vpack.c.bf16 %v608_v27, %v605_v26  ;;  %v509_v33 = vadd.f32 %v1223_v25, %v508_v32  ;;  %v1296_v34 = vpop.f32.mrb[2].mxu0 }
 0x1b8   : > { %v520_v36 = vadd.f32 %v1296_v34, %v1223_v25  ;;  %v511_v37 = vpop.f32.mrb[3].mxu0 }
 0x1b9   : > { %1325 = vmatprep.subr.bf16.mxu1 %v635_v30  ;;  %v1311_v35 = vpop.f32.mrb[4].mxu1  ;;  %v512_v40 = vadd.f32 %v1223_v25, %v511_v37 }
 0x1ba   : > { %1326 = vmatpush3.bf16.xpose.msra.mxu1 %v635_v30  ;;  %v629_v38 = vadd.f32 %v1311_v35, %v1230_v19  ;;  %v620_v39 = vpop.f32.mrb[5].mxu1  ;;  %v540_v43 = vpack.c.bf16 %v520_v36, %v517_v31 }
 0x1bb   : > { %1327 = vmatprep.subr.bf16.mxu1 %v636_v28  ;;  %v621_v41 = vadd.f32 %v1230_v19, %v620_v39  ;;  %v1312_v42 = vpop.f32.mrb[6].mxu1  ;;  %v539_v46 = vpack.c.bf16 %v512_v40, %v509_v33 }
 0x1bc   : > { %v632_v44 = vadd.f32 %v1312_v42, %v1230_v19  ;;  %v623_v45 = vpop.f32.mrb[7].mxu1 }
 0x1bd   : > { %v624_v47 = vadd.f32 %v1230_v19, %v623_v45  ;;  %1333 = vmatprep.mubr.bf16.mxu1 %v539_v46  ;;  %v1299_v49 = vpop.f32.mrb[4].mxu0 }
 0x1be   : > { %v638_v48 = vpack.c.bf16 %v632_v44, %v629_v38  ;;  %v533_v51 = vadd.f32 %v1299_v49, %v1223_v25  ;;  %v524_v52 = vpop.f32.mrb[5].mxu0 }
 0x1bf   : > { %v637_v50 = vpack.c.bf16 %v624_v47, %v621_v41  ;;  %v525_v53 = vadd.f32 %v1223_v25, %v524_v52  ;;  %v1300_v54 = vpop.f32.mrb[6].mxu0 }
 0x1c0   : > { %v536_v55 = vadd.f32 %v1300_v54, %v1223_v25  ;;  %v527_v56 = vpop.f32.mrb[7].mxu0 }
 0x1c1   : > { %v528_v57 = vadd.f32 %v1223_v25, %v527_v56 }
 0x1c2   : > { %1328 = vmatpush3.bf16.xpose.msra.mxu1 %v636_v28  ;;  %v542_v58 = vpack.c.bf16 %v536_v55, %v533_v51 }
 0x1c3   : > { %1329 = vmatprep.subr.bf16.mxu1 %v637_v50  ;;  %v541_v59 = vpack.c.bf16 %v528_v57, %v525_v53 }
 0x1c5   : > { %v1319_v61 = vpop.f32.mrb[8].mxu0 }
 0x1c6   : > { %v709_v62 = vadd.f32 %v1319_v61, %v1237_v60  ;;  %v700_v63 = vpop.f32.mrb[9].mxu0 }
 0x1c7   : > { %v701_v0 = vadd.f32 %v1237_v60, %v700_v63  ;;  %v1320_v1 = vpop.f32.mrb[10].mxu0 }
 0x1c8   : > { %v712_v4 = vadd.f32 %v1320_v1, %v1237_v60  ;;  %v703_v9 = vpop.f32.mrb[11].mxu0 }
 0x1c9   : > { %v704_v10 = vadd.f32 %v1237_v60, %v703_v9 }
 0x1ca   : > { %1330 = vmatpush3.bf16.xpose.msra.mxu1 %v637_v50  ;;  %v732_v11 = vpack.c.bf16 %v712_v4, %v709_v62 }
 0x1cb   : > { %1331 = vmatprep.subr.bf16.mxu1 %v638_v48  ;;  %v731_v12 = vpack.c.bf16 %v704_v10, %v701_v0 }
 0x1cc   : > { %737 = vst.msk [vmem:[#allocation4 + $0x8] sm:$0xff] %vm735_vm1, %v732_v11 }
 0x1cd   : > { %736 = vst.msk [vmem:[#allocation4] sm:$0xff] %vm735_vm1, %v731_v12  ;;  %v1323_v15 = vpop.f32.mrb[12].mxu0 }
 0x1ce   : > { %v725_v16 = vadd.f32 %v1323_v15, %v1237_v60  ;;  %v716_v17 = vpop.f32.mrb[13].mxu0 }
 0x1cf   : > { %v717_v18 = vadd.f32 %v1237_v60, %v716_v17  ;;  %v1324_v19 = vpop.f32.mrb[14].mxu0  ;;  %v1824_v17 = vmov 32  }
 0x1d0   : > { %v728_v20 = vadd.f32 %v1324_v19, %v1237_v60  ;;  %v719_v21 = vpop.f32.mrb[15].mxu0  ;;  %1488 = vset.pattern.permute.xlu1 %v1824_v17  ;;  %1487 = vset.pattern.permute.xlu0 %v1824_v17 }
 0x1d1   : > { %v720_v22 = vadd.f32 %v1237_v60, %v719_v21 }
 0x1d2   : > { %1332 = vmatpush3.bf16.xpose.msra.mxu1 %v638_v48  ;;  %v734_v23 = vpack.c.bf16 %v728_v20, %v725_v16 }
 0x1d3   : > { %v733_v24 = vpack.c.bf16 %v720_v22, %v717_v18  ;;  %v868_v42 = vld [vmem:[#allocation4 + $0x8] sm:$0xff] }
 0x1d4   : > { %739 = vst.msk [vmem:[#allocation4 + $0x18] sm:$0xff] %vm735_vm1, %v734_v23  ;;  %v867_v25 = vld [vmem:[#allocation4] sm:$0xff] }
 0x1d5   : > { %738 = vst.msk [vmem:[#allocation4 + $0x10] sm:$0xff] %vm735_vm1, %v733_v24  ;;  %1341 = vmatprep.subr.bf16.mxu0 %v867_v25 }
 0x1d6   : > { %1342 = vmatpush3.bf16.msra.mxu0 %v867_v25 }
 0x1d7   : > { %1343 = vmatprep.subr.bf16.mxu0 %v868_v42 }
 0x1d9   : > { %1334 = vmatmul.mubr.bf16.vlgmr.msra.gmra.mrb[8].mxu1 %v540_v43 }
 0x1da   : > { %1337 = vmatprep.mubr.bf16.mxu1 %v541_v59  ;;  %1344 = vmatpush3.bf16.msra.mxu0 %v868_v42 }
 0x1db   : > { %v870_v44 = vld [vmem:[#allocation4 + $0x18] sm:$0xff] }
 0x1dc   : > { %v869_v43 = vld [vmem:[#allocation4 + $0x10] sm:$0xff] }
 0x1dd   : > { %1345 = vmatprep.subr.bf16.mxu0 %v869_v43 }
 0x1de   : > { %1346 = vmatpush3.bf16.msra.mxu0 %v869_v43 }
 0x1df   : > { %1347 = vmatprep.subr.bf16.mxu0 %v870_v44 }
 0x1e1   : > { %1338 = vmatmul.mubr.bf16.gmra.mrb[12].mxu1 %v542_v58 }
 0x1e2   : > { %1348 = vmatpush3.bf16.msra.mxu0 %v870_v44 }
 0x2ac   : > { %v1335_v26 = vpop.f32.mrb[8].mxu1 }
 0x2ad   : > { %v787_v27 = vpop.f32.mrb[9].mxu1  ;;  %v825_v28 = vsel %vm818_vm2, %v1335_v26, -inf }
 0x2ae   : > { %826 = vmax.xlane.f32.xlu1 %v825_v28  ;;  %v1336_v29 = vpop.f32.mrb[10].mxu1  ;;  %v819_v30 = vsel %vm818_vm2, %v787_v27, -inf }
 0x2af   : > { %820 = vmax.xlane.f32.xlu0 %v819_v30  ;;  %v790_v31 = vpop.f32.mrb[11].mxu1  ;;  %v828_v32 = vsel %vm818_vm2, %v1336_v29, -inf }
 0x2b0   : > { %v822_v33 = vsel %vm818_vm2, %v790_v31, -inf }
 0x2b2   : > { %829 = vmax.xlane.f32.xlu1 %v828_v32 }
 0x2b3   : > { %823 = vmax.xlane.f32.xlu0 %v822_v33 }
 0x2b4   : > { %v1339_v34 = vpop.f32.mrb[12].mxu1 }
 0x2b5   : > { %v803_v35 = vpop.f32.mrb[13].mxu1  ;;  %v837_v40 = vsel %vm818_vm2, %v1339_v34, -inf }
 0x2b6   : > { %v1340_v36 = vpop.f32.mrb[14].mxu1  ;;  %v831_v37 = vsel %vm818_vm2, %v803_v35, -inf }
 0x2b7   : > { %832 = vmax.xlane.f32.xlu0 %v831_v37  ;;  %v806_v38 = vpop.f32.mrb[15].mxu1  ;;  %v840_v41 = vsel %vm818_vm2, %v1340_v36, -inf }
 0x2b8   : > { %v834_v39 = vsel %vm818_vm2, %v806_v38, -inf }
 0x2b9   : > { %835 = vmax.xlane.f32.xlu1 %v834_v39 }
 0x2bb   : > { %838 = vmax.xlane.f32.xlu0 %v837_v40 }
 0x2bd   : > { %841 = vmax.xlane.f32.xlu1 %v840_v41 }
 0x33b   : > { %v827_v45 = vpop.xlane.xlu1 %826 }
 0x33c   : > { %v821_v46 = vpop.xlane.xlu0 %820  ;;  %v845_v48 = vsub.f32 %v1335_v26, %v827_v45 }
 0x33d   : > { %v843_v51 = vsub.f32 %v787_v27, %v821_v46 }
 0x33f   : > { %v830_v47 = vpop.xlane.xlu1 %829 }
 0x340   : > { %v846_v49 = vsub.f32 %v1336_v29, %v830_v47  ;;  %v824_v50 = vpop.xlane.xlu0 %823 }
 0x341   : > { %v844_v52 = vsub.f32 %v790_v31, %v824_v50 }
 0x342   : > { %v852_v53 = vpack.c.bf16 %v846_v49, %v845_v48 }
 0x343   : > { %v851_v54 = vpack.c.bf16 %v844_v52, %v843_v51 }
 0x344   : > { %v859_v55 = vmul.bf16 1069105081, %v852_v53  ;;  %v833_v56 = vpop.xlane.xlu0 %832 }
 0x345   : > { %v856_v57 = vmul.bf16 1069105081, %v851_v54  ;;  %v847_v59 = vsub.f32 %v803_v35, %v833_v56 }
 0x346   : > { %v836_v58 = vpop.xlane.xlu1 %835 }
 0x347   : > { %1495 = vpow.bf16 %v856_v57  ;;  %v848_v60 = vsub.f32 %v806_v38, %v836_v58 }
 0x348   : > { %1497 = vpow.bf16 %v859_v55  ;;  %v839_v61 = vpop.xlane.xlu0 %838 }
 0x349   : > { %v853_v62 = vpack.c.bf16 %v848_v60, %v847_v59  ;;  %v849_v1 = vsub.f32 %v1339_v34, %v839_v61  ;;  %v1014_v34 = vstv %s965_s13 }
 0x34a   : > { %v842_v63 = vpop.xlane.xlu1 %841 }
 0x34b   : > { %v862_v0 = vmul.bf16 1069105081, %v853_v62  ;;  %v850_v4 = vsub.f32 %v1340_v36, %v842_v63 }
 0x34d   : > { %1499 = vpow.bf16 %v862_v0  ;;  %v854_v9 = vpack.c.bf16 %v850_v4, %v849_v1 }
 0x34f   : > { %v865_v10 = vmul.bf16 1069105081, %v854_v9 }
 0x351   : > { %1501 = vpow.bf16 %v865_v10 }
 0x352   : > { %v1496_v11 = vpop.eup %1495 }
 0x353   : > { %v1498_v12 = vpop.eup %1497  ;;  %1349 = vmatprep.mubr.msk.bf16.mxu0 %vm818_vm2, %v1496_v11 }
 0x354   : > { %1350 = vmatmul.mubr.msk.bf16.vlgmr.msra.gmra.mrb[16].mxu0 %vm818_vm2, %v1498_v12 }
 0x358   : > { %v1500_v15 = vpop.eup %1499 }
 0x359   : > { %1353 = vmatprep.mubr.msk.bf16.mxu0 %vm818_vm2, %v1500_v15 }
 0x35c   : > { %v1502_v16 = vpop.eup %1501 }
 0x35d   : > { %1354 = vmatmul.mubr.msk.bf16.gmra.mrb[20].mxu0 %vm818_vm2, %v1502_v16 }
 0x427   : > { %v1351_v18 = vpop.f32.mrb[16].mxu0 }
 0x428   : > { %1503 = vrcp.f32 %v1351_v18  ;;  %v917_v19 = vpop.f32.mrb[17].mxu0 }
 0x429   : > { %1505 = vrcp.f32 %v917_v19  ;;  %v1352_v20 = vpop.f32.mrb[18].mxu0 }
 0x42a   : > { %v920_v21 = vpop.f32.mrb[19].mxu0  ;;  %1507 = vrcp.f32 %v1352_v20 }
 0x42b   : > { %1509 = vrcp.f32 %v920_v21 }
 0x430   : > { %v1355_v22 = vpop.f32.mrb[20].mxu0 }
 0x431   : > { %v933_v23 = vpop.f32.mrb[21].mxu0  ;;  %1511 = vrcp.f32 %v1355_v22 }
 0x432   : > { %v1504_v24 = vpop.eup %1503  ;;  %v1356_v25 = vpop.f32.mrb[22].mxu0  ;;  %1513 = vrcp.f32 %v933_v23 }
 0x433   : > { %v1506_v26 = vpop.eup %1505  ;;  %978 = vperm.xlu1 %1488, %v1504_v24   ;;  %v936_v27 = vpop.f32.mrb[23].mxu0 }
 0x434   : > { %968 = vperm.xlu0 %1487, %v1506_v26   ;;  %v1508_v28 = vpop.eup %1507  ;;  %1515 = vrcp.f32 %v936_v27 }
 0x435   : > { %v1510_v29 = vpop.eup %1509  ;;  %1517 = vrcp.f32 %v1356_v25 }
 0x437   : > { %983 = vperm.xlu1 %1488, %v1508_v28  }
 0x43b   : > { %973 = vperm.xlu1 %1488, %v1510_v29   ;;  %v1512_v30 = vpop.eup %1511 }
 0x43c   : > { %v1514_v31 = vpop.eup %1513 }
 0x43e   : > { %v1516_v32 = vpop.eup %1515 }
 0x43f   : > { %998 = vperm.xlu1 %1488, %v1512_v30   ;;  %v1518_v33 = vpop.eup %1517 }
 0x443   : > { %988 = vperm.xlu1 %1488, %v1514_v31  }
 0x447   : > { %993 = vperm.xlu1 %1488, %v1516_v32  }
 0x44b   : > { %1003 = vperm.xlu1 %1488, %v1518_v33  }
 0x4b2   : > { %v979_v35 = vpop.permute.xlu1 %978 }
 0x4b3   : > { %v1008_v36 = vmul.f32 %v1351_v18, %v979_v35  ;;  %v969_v37 = vpop.permute.xlu0 %968 }
 0x4b4   : > { %v1006_v38 = vmul.f32 %v969_v37, %v917_v19 }
 0x4b5   : > { %v1017_v39 = vmul.f32 %v1014_v34, %v1008_v36 }
 0x4b6   : > { %v1015_v40 = vmul.f32 %v1014_v34, %v1006_v38  ;;  %v984_v41 = vpop.permute.xlu1 %983 }
 0x4b7   : > { %v1025_v42 = vadd.f32 %v1017_v39, %v2183_v5  ;;  %v1009_v43 = vmul.f32 %v1352_v20, %v984_v41 }
 0x4b8   : > { %v1023_v44 = vadd.f32 %v1015_v40, %v2175_v2 }
 0x4b9   : > { %1034 = vst.msk [vmem:[%s2238_s14 + $0x10] sm:$0xff] %vm461_vm0, %v1025_v42  ;;  %v1018_v45 = vmul.f32 %v1014_v34, %v1009_v43 }
 0x4ba   : > { %1032 = vst.msk [vmem:[%s2238_s14] sm:$0xff] %vm461_vm0, %v1023_v44  ;;  %v974_v46 = vpop.permute.xlu1 %973 }
 0x4bb   : > { %v1026_v47 = vadd.f32 %v1018_v45, %v2186_v6  ;;  %v1007_v5 = vmul.f32 %v974_v46, %v920_v21 }
 0x4bd   : > { %1035 = vst.msk [vmem:[%s2238_s14 + $0x18] sm:$0xff] %vm461_vm0, %v1026_v47  ;;  %v1016_v2 = vmul.f32 %v1014_v34, %v1007_v5 }
 0x4be   : > { %v999_v48 = vpop.permute.xlu1 %998 }
 0x4bf   : > { %v1024_v49 = vadd.f32 %v1016_v2, %v2178_v3  ;;  %v1012_v50 = vmul.f32 %v1355_v22, %v999_v48 }
 0x4c1   : > { %1033 = vst.msk [vmem:[%s2238_s14 + $0x8] sm:$0xff] %vm461_vm0, %v1024_v49  ;;  %v1021_v51 = vmul.f32 %v1014_v34, %v1012_v50 }
 0x4c2   : > { %v989_v52 = vpop.permute.xlu1 %988 }
 0x4c3   : > { %v1029_v53 = vadd.f32 %v1021_v51, %v2203_v13  ;;  %v1010_v54 = vmul.f32 %v989_v52, %v933_v23 }
 0x4c5   : > { %1038 = vst.msk [vmem:[%s2238_s14 + $0x30] sm:$0xff] %vm461_vm0, %v1029_v53  ;;  %v1019_v6 = vmul.f32 %v1014_v34, %v1010_v54 }
 0x4c6   : > { %v994_v55 = vpop.permute.xlu1 %993 }
 0x4c7   : > { %v1027_v56 = vadd.f32 %v1019_v6, %v2189_v7  ;;  %v1011_v3 = vmul.f32 %v994_v55, %v936_v27 }
 0x4c9   : > { %1036 = vst.msk [vmem:[%s2238_s14 + $0x20] sm:$0xff] %vm461_vm0, %v1027_v56  ;;  %v1020_v57 = vmul.f32 %v1014_v34, %v1011_v3 }
 0x4ca   : > { %v1004_v58 = vpop.permute.xlu1 %1003 }
 0x4cb   : > { %v1028_v59 = vadd.f32 %v1020_v57, %v2192_v8  ;;  %v1013_v60 = vmul.f32 %v1356_v25, %v1004_v58 }
 0x4cd   : > { %1037 = vst.msk [vmem:[%s2238_s14 + $0x28] sm:$0xff] %vm461_vm0, %v1028_v59  ;;  %v1022_v13 = vmul.f32 %v1014_v34, %v1013_v60 }
 0x4cf   : > { %v1030_v7 = vadd.f32 %v1022_v13, %v2206_v14 }
 0x4d1   : > { %1039 = vst.msk [vmem:[%s2238_s14 + $0x38] sm:$0xff] %vm461_vm0, %v1030_v7 }
 0x4d2   : > { %1730 = shalt.err (!%p1727_p8)
}
 0x4d3   : > { %s1731_s26 = scalar_lea.hbm %s2264_s28, 1024  ;;  %s1735_s14 = scalar_lea.hbm %s2349_s20, 2048 }
 0x4d4   : > { %p1732_p3 = scmp.ne.s32.totalorder %s2264_s28, %s1731_s26  ;;  %p1736_p13 = scmp.lt.u32.totalorder %s2264_s28, %s2349_s20 }
 0x4d5   : > { %p1737_p1 = scmp.lt.u32.totalorder %s1735_s14, %s1731_s26  ;;  %p1739_p2 = scmp.lt.u32.totalorder %s1731_s26, %s2264_s28 }
 0x4d6   : > { %p1733_p11 = pnand %p1732_p3, %p2350_p9 }
 0x4d7   : > { %p1738_p4 = por %p1737_p1, %p1736_p13 }
 0x4d8   : > { %p1734_p6 = pneg %p1733_p11 }
 0x4d9   : > { %p1740_p10 = por %p1739_p2, %p1738_p4 }
 0x4db   : > { %p1741_p12 = pnand %p1740_p10, %p1734_p6 }
 0x4dd   : > { %1744 = shalt.err (!%p1741_p12)
}
 0x4de   : > { %s1826_s17 = smov 128   ;;  %s1827_s10 = smov 8  }
 0x4df   : > { %1383 = dma.vmem_to_hbm [thread:$0]  (%p2350_p9), %s2266_s16, 1024, %s2264_s28, %s1041_s21, %s1826_s17, %s1826_s17, %s1827_s10  }
 0x4e0 PF: > { %s1071_s22 = sand.u32 1, %s1791_s29   ;;  %p2351_p0 = scmp.ne.s32.totalorder %s2345_s24, 0 }
 0x4e1   : > { %p2352_p7 = scmp.ge.s32.totalorder %s1811_s12, 2  ;;  %s1072_s15 = scalar_lea.sflag [#allocation8], %s1071_s22 }
 0x4e3   : > { %p1409_p5 = pnand %p2352_p7, %p2351_p0 }
 0x4e5   : > { %1786 = dma.done.wait (!%p1409_p5), %s1072_s15, 1024  }
 0x4e6   : > { %1788 = vsyncadd (!%p1409_p5), %s1072_s15, 4294966272  ;;  %s28_s12 = sadd.s32 1, %s1811_s12   ;;  %s2353_s29 = smov %s1795_s30 }
 0x4e7   : > { %p25_p8 = scmp.ge.s32.totalorder %s28_s12, 4   ;;  %s2354_s30 = smov %s1799_s9 }
 0x4e8   : > { %s2355_s9 = smov %s2097_s7  ;;  %s2356_s10 = smov %s1807_s11 }
 0x4e9   : > { %s2357_s11 = smov %s2359_s19  ;;  %27 = sbr.rel (!%p25_p8) target bundleno = 13 (0xd), region = 127 }
 0x4f0   :  { %1077 = vsyncpa [#allocation7], 1 }
 0x4f1   :  { %1079 = vsyncpa [#allocation7 + $0x1], 1 }
 0x4f2   :  { %1080 = vsyncpa [#allocation10], 1 }
 0x4f3   :  { %1081 = vsyncpa [#allocation13], 1 }
 0x4f4   :  { %1082 = vsyncpa [#allocation16], 1 }
 0x4f5   :  { %1083 = vsyncpa [#allocation8], 1 }
 0x4f6   :  { %1085 = vsyncpa [#allocation8 + $0x1], 1 }

</bundles_post_ra>
